<compile_context>
chip_gen: v7x
topology: tpu7x:2x2x1
jax: 0.10.0
libtpu: 0.0.40
codegen_flags: <defaults>
</compile_context>

<pallas_src>
import jax
import jax.numpy as jnp
from jax.experimental import pallas as pl
from jax.experimental.pallas import tpu as pltpu

LANE = 128      # vreg lane width
SUBLANE = 8     # vreg sublane count (f32)


def _round_up(n: int, m: int) -> int:
    return (n + m - 1) // m * m


def _dqn_mlp_kernel(x_ref, w1t_ref, b1_ref, w2t_ref, b2_ref, o_ref):
    # x_ref:   [tb, F]   (input dtype; cast to bf16 in-register)
    # w1t_ref: [F,  Hp]  bf16      b1_ref: [1, Hp] f32
    # w2t_ref: [Hp, A ]  bf16      b2_ref: [1, A ] f32
    # o_ref:   [tb, A ]  f32       (natural width; masked vst, but mem-bound win)
    x = x_ref[...].astype(jnp.bfloat16)
    h = jnp.dot(x, w1t_ref[...], preferred_element_type=jnp.float32)
    h = jnp.maximum(h + b1_ref[...], 0.0)                      # bias + ReLU (VPU)
    out = jnp.dot(h.astype(jnp.bfloat16), w2t_ref[...],
                  preferred_element_type=jnp.float32)
    o_ref[...] = (out + b2_ref[...]).astype(o_ref.dtype)


def prepare_params(w1, b1, w2, b2):
    """One-time prep OUTSIDE the hot loop: transpose PyTorch-layout weights,
    zero-pad the hidden dim to 128 lanes, store weights as bf16 (biases f32)."""
    H, F = w1.shape                    # torch Linear: [out_features, in_features]
    A = w2.shape[0]
    Hp = _round_up(H, LANE)

    w1t = jnp.zeros((F, Hp), jnp.bfloat16).at[:, :H].set(
        jnp.asarray(w1, jnp.float32).T.astype(jnp.bfloat16))
    b1p = jnp.zeros((1, Hp), jnp.float32).at[0, :H].set(
        jnp.asarray(b1, jnp.float32))
    w2t = jnp.zeros((Hp, A), jnp.bfloat16).at[:H, :].set(
        jnp.asarray(w2, jnp.float32).T.astype(jnp.bfloat16))
    b2p = jnp.asarray(b2, jnp.float32).reshape(1, A)
    return w1t, b1p, w2t, b2p


def dqn_net_forward(x, params, *, tb=None):
    """Pallas forward for DQNNet.

    x:        [B, F] (any float dtype), streamed at natural width
    params:   output of prepare_params(w1, b1, w2, b2)
    returns:  [B, n_actions] float32
    """
    w1t, b1p, w2t, b2p = params
    B, F = x.shape
    assert F == w1t.shape[0], "feature dim mismatch with prepared params"
    Hp = w1t.shape[1]
    A = w2t.shape[1]

    if tb is None:
        if B <= 512:
            tb = _round_up(B, SUBLANE)                    # single tile
        else:
            # >= 2 tiles so v7x megacore "parallel" has work to shard;
            # up to 1024 rows/tile to amortize the ~0.35 us per-step overhead.
            tb = min(1024, _round_up(pl.cdiv(B, 2), SUBLANE))
    else:
        tb = _round_up(tb, SUBLANE)                       # guard (8,128) rule
    tb = max(tb, SUBLANE)

    grid = pl.cdiv(B, tb)   # trailing partial block is masked by Pallas; rows
                            # are independent, so no batch padding is needed.

    return pl.pallas_call(
        _dqn_mlp_kernel,
        out_shape=jax.ShapeDtypeStruct((B, A), jnp.float32),
        grid=(grid,),
        in_specs=[
            pl.BlockSpec((tb, F), lambda i: (i, 0)),   # x: streamed, natural F
            pl.BlockSpec((F, Hp), lambda i: (0, 0)),   # W1^T: VMEM-resident
            pl.BlockSpec((1, Hp), lambda i: (0, 0)),   # b1:   resident
            pl.BlockSpec((Hp, A), lambda i: (0, 0)),   # W2^T: resident
            pl.BlockSpec((1, A), lambda i: (0, 0)),    # b2:   resident
        ],
        out_specs=pl.BlockSpec((tb, A), lambda i: (i, 0)),   # natural-width out
        compiler_params=pltpu.CompilerParams(
            dimension_semantics=("parallel",)),        # batch tiles independent
    )(x, w1t, b1p, w2t, b2p)


def _reference_forward(x, w1, b1, w2, b2):
    h = jnp.maximum(x.astype(jnp.float32) @ w1.T + b1, 0.0)
    return h @ w2.T + b2


if __name__ == "__main__":
    # Shapes consistent with the module: x is [batch, n_features].
    n_features = 4
    n_actions = 3
    hidden = 10
    batch = 2

    key = jax.random.PRNGKey(0)
    kx, k1, k2, k3, k4, kx2, kx3 = jax.random.split(key, 7)

    x = jax.random.normal(kx, (batch, n_features), dtype=jnp.float32)

    # Deterministic parameter init (uniform, like PyTorch Linear's default).
    bound1 = 1.0 / jnp.sqrt(jnp.float32(n_features))
    w1 = jax.random.uniform(k1, (hidden, n_features), minval=-bound1,
                            maxval=bound1, dtype=jnp.float32)
    b1 = jax.random.uniform(k2, (hidden,), minval=-bound1, maxval=bound1,
                            dtype=jnp.float32)
    bound2 = 1.0 / jnp.sqrt(jnp.float32(hidden))
    w2 = jax.random.uniform(k3, (n_actions, hidden), minval=-bound2,
                            maxval=bound2, dtype=jnp.float32)
    b2 = jax.random.uniform(k4, (n_actions,), minval=-bound2, maxval=bound2,
                            dtype=jnp.float32)

    # One-time parameter prep (transpose + pad + bf16) — outside the hot path.
    params = prepare_params(w1, b1, w2, b2)

    # bf16 activation/weight streams with f32 accumulation: compare against the
    # f32 reference with a correspondingly loose tolerance.
    ATOL = 5e-2
    RTOL = 5e-2

    # Tiny batch (the module's typical single-state call).
    out = jax.block_until_ready(dqn_net_forward(x, params))
    ref = _reference_forward(x, w1, b1, w2, b2)
    assert out.shape == (batch, n_actions)
    assert jnp.allclose(out, ref, atol=ATOL, rtol=RTOL)

    # Replay-batch sized call (single tile, B not a multiple of 8-free sizes).
    big_b = 200
    x_big = jax.random.normal(kx2, (big_b, n_features), dtype=jnp.float32)
    out_big = jax.block_until_ready(dqn_net_forward(x_big, params))
    ref_big = _reference_forward(x_big, w1, b1, w2, b2)
    assert out_big.shape == (big_b, n_actions)
    assert jnp.allclose(out_big, ref_big, atol=ATOL, rtol=RTOL)

    # Larger batch: exercises the >=2-tile grid and the trailing partial block.
    xl_b = 1000
    x_xl = jax.random.normal(kx3, (xl_b, n_features), dtype=jnp.float32)
    out_xl = jax.block_until_ready(dqn_net_forward(x_xl, params))
    ref_xl = _reference_forward(x_xl, w1, b1, w2, b2)
    assert out_xl.shape == (xl_b, n_actions)
    assert jnp.allclose(out_xl, ref_xl, atol=ATOL, rtol=RTOL)

    print("KERNEL_OK")
</pallas_src>

<mosaic_0001>
module attributes {stable_mosaic.version = 11 : i64} {
  func.func @_dqn_mlp_kernel(%arg0: i32, %arg1: memref<8x4xf32, #tpu.memory_space<vmem>>, %arg2: memref<4x128xbf16, #tpu.memory_space<vmem>>, %arg3: memref<1x128xf32, #tpu.memory_space<vmem>>, %arg4: memref<128x3xbf16, #tpu.memory_space<vmem>>, %arg5: memref<1x3xf32, #tpu.memory_space<vmem>>, %arg6: memref<8x3xf32, #tpu.memory_space<vmem>>) attributes {dimension_semantics = [#tpu.dimension_semantics<parallel>], iteration_bounds = array<i64: 1>, scalar_prefetch = 0 : i64, scratch_operands = 0 : i64, tpu.core_type = #tpu.core_type<tc>, window_params = [{transform_indices = @transform_0, window_bounds = array<i64: 8, 4>}, {pipeline_mode = #tpu.pipeline_mode<synchronous>, transform_indices = @transform_1, window_bounds = array<i64: 4, 128>}, {pipeline_mode = #tpu.pipeline_mode<synchronous>, transform_indices = @transform_2, window_bounds = array<i64: 1, 128>}, {pipeline_mode = #tpu.pipeline_mode<synchronous>, transform_indices = @transform_3, window_bounds = array<i64: 128, 3>}, {pipeline_mode = #tpu.pipeline_mode<synchronous>, transform_indices = @transform_4, window_bounds = array<i64: 1, 3>}, {transform_indices = @transform_5, window_bounds = array<i64: 8, 3>}]} {
    %c0 = arith.constant 0 : index
    %c0_0 = arith.constant 0 : index
    %0 = vector.load %arg1[%c0, %c0_0] : memref<8x4xf32, #tpu.memory_space<vmem>>, vector<8x4xf32>
    %1 = arith.truncf %0 : vector<8x4xf32> to vector<8x4xbf16>
    %c0_1 = arith.constant 0 : index
    %c0_2 = arith.constant 0 : index
    %2 = vector.load %arg2[%c0_1, %c0_2] : memref<4x128xbf16, #tpu.memory_space<vmem>>, vector<4x128xbf16>
    %cst = arith.constant dense<0.000000e+00> : vector<8x128xf32>
    %3 = tpu.matmul %1, %2, %cst {dimension_numbers = #tpu.dot_dimension_numbers<[1], [0], [0], [1], [0, 0, 1, 1], [], []>} : vector<8x4xbf16>, vector<4x128xbf16>, vector<8x128xf32> -> vector<8x128xf32>
    %c0_3 = arith.constant 0 : index
    %c0_4 = arith.constant 0 : index
    %4 = vector.load %arg3[%c0_3, %c0_4] : memref<1x128xf32, #tpu.memory_space<vmem>>, vector<1x128xf32>
    %5 = vector.broadcast %4 : vector<1x128xf32> to vector<8x128xf32>
    %6 = arith.addf %3, %5 : vector<8x128xf32>
    %cst_5 = arith.constant 0.000000e+00 : f32
    %7 = vector.broadcast %cst_5 : f32 to vector<8x128xf32>
    %8 = arith.maximumf %6, %7 : vector<8x128xf32>
    %9 = arith.truncf %8 : vector<8x128xf32> to vector<8x128xbf16>
    %c0_6 = arith.constant 0 : index
    %c0_7 = arith.constant 0 : index
    %10 = vector.load %arg4[%c0_6, %c0_7] : memref<128x3xbf16, #tpu.memory_space<vmem>>, vector<128x3xbf16>
    %cst_8 = arith.constant dense<0.000000e+00> : vector<8x3xf32>
    %11 = tpu.matmul %9, %10, %cst_8 {dimension_numbers = #tpu.dot_dimension_numbers<[1], [0], [0], [1], [0, 0, 1, 1], [], []>} : vector<8x128xbf16>, vector<128x3xbf16>, vector<8x3xf32> -> vector<8x3xf32>
    %c0_9 = arith.constant 0 : index
    %c0_10 = arith.constant 0 : index
    %12 = vector.load %arg5[%c0_9, %c0_10] : memref<1x3xf32, #tpu.memory_space<vmem>>, vector<1x3xf32>
    %13 = vector.broadcast %12 : vector<1x3xf32> to vector<8x3xf32>
    %14 = arith.addf %11, %13 : vector<8x3xf32>
    %c0_11 = arith.constant 0 : index
    %c0_12 = arith.constant 0 : index
    %15 = vector.load %arg6[%c0_11, %c0_12] : memref<8x3xf32, #tpu.memory_space<vmem>>, vector<8x3xf32>
    tpu.vector_store %arg6[%c0_11, %c0_12], %14 {strides = array<i32>} : memref<8x3xf32, #tpu.memory_space<vmem>>, vector<8x3xf32>,
    return
  }
  func.func @transform_0(%arg0: i32) -> (i32, i32) {
    %c0_i32 = arith.constant 0 : i32
    %c0_i32_0 = arith.constant 0 : i32
    return %arg0, %c0_i32 : i32, i32
  }
  func.func @transform_1(%arg0: i32) -> (i32, i32) {
    %c0_i32 = arith.constant 0 : i32
    %c0_i32_0 = arith.constant 0 : i32
    %c0_i32_1 = arith.constant 0 : i32
    return %c0_i32, %c0_i32_0 : i32, i32
  }
  func.func @transform_2(%arg0: i32) -> (i32, i32) {
    %c0_i32 = arith.constant 0 : i32
    %c0_i32_0 = arith.constant 0 : i32
    %c0_i32_1 = arith.constant 0 : i32
    return %c0_i32, %c0_i32_0 : i32, i32
  }
  func.func @transform_3(%arg0: i32) -> (i32, i32) {
    %c0_i32 = arith.constant 0 : i32
    %c0_i32_0 = arith.constant 0 : i32
    %c0_i32_1 = arith.constant 0 : i32
    return %c0_i32, %c0_i32_0 : i32, i32
  }
  func.func @transform_4(%arg0: i32) -> (i32, i32) {
    %c0_i32 = arith.constant 0 : i32
    %c0_i32_0 = arith.constant 0 : i32
    %c0_i32_1 = arith.constant 0 : i32
    return %c0_i32, %c0_i32_0 : i32, i32
  }
  func.func @transform_5(%arg0: i32) -> (i32, i32) {
    %c0_i32 = arith.constant 0 : i32
    %c0_i32_0 = arith.constant 0 : i32
    return %arg0, %c0_i32 : i32, i32
  }
}

</mosaic_0001>

<bundles_post_ra>
// kernel: tpu_custom_call.1
= control target key start
LH: loop header
LB: loop body
LE: loop exit
PB: predicated region body
PF: predicated region fallthrough
CT: control target
= control target key end

     0   :  { %10 = vsyncpa [#allocation3], 0  ;;  %vm36_vm0 = vcmask 1041408   ;;  %v296_v1 = vmov 0.0   ;;  %vm297_vm1 = vmmov 0   ;;  %vm32_vm2 = vcmask 31744   ;;  %s379_s0 = inlined_call_operand.vmem [shape: f32[2,4], index: 0, kind: input, shape index: {}]   ;;  %s380_s1 = inlined_call_operand.vmem [shape: bf16[4,128], index: 1, kind: input, shape index: {}]   ;;  %s381_s2 = inlined_call_operand.vmem [shape: f32[1,128], index: 2, kind: input, shape index: {}]   ;;  %s382_s3 = inlined_call_operand.vmem [shape: bf16[128,3], index: 3, kind: input, shape index: {}]   ;;  %s383_s4 = inlined_call_operand.vmem [shape: f32[1,3], index: 4, kind: input, shape index: {}]   ;;  %s384_s5 = inlined_call_operand.hbm [shape: f32[2,3], index: 5, kind: output, shape index: {}]  }
   0x1   :  { %v24_v0 = vld [vmem:[%s380_s1] sm:$0x3]  ;;  %233 = vmatprep.subr.bf16.mxu0 %v296_v1  ;;  %239 = vmatprep.subr.bf16.mxu1 %v296_v1  ;;  %v265_v6 = vld [vmem:[%s382_s3 + $0x8] sm:$0xff]   ;;  %v266_v7 = vld [vmem:[%s382_s3 + $0x10] sm:$0xff]   ;;  %vm193_vm3 = vcmask 23552  }
   0x2   :  { %v38_v2 = vsel %vm36_vm0, %v24_v0, 0  ;;  %v22_v3 = vld [vmem:[%s379_s0] sm:$0xff]  ;;  %235 = vmatprep.mubr.msk.bf16.mxu0 %vm297_vm1, %v296_v1  ;;  %255 = vmatprep.mubr.msk.bf16.mxu1 %vm297_vm1, %v296_v1  ;;  %v267_v8 = vld [vmem:[%s382_s3 + $0x18] sm:$0xff]   ;;  %v269_v10 = vld [vmem:[%s382_s3 + $0x28] sm:$0xff]  }
   0x3   :  { %234 = vmatpush3.bf16.msra.mxu0 %v38_v2  ;;  %v23_v4 = vpack.c.bf16 %v22_v3, %v22_v3  ;;  %v264_v5 = vld [vmem:[%s382_s3] sm:$0xff]   ;;  %v270_v11 = vld [vmem:[%s382_s3 + $0x30] sm:$0xff]   ;;  %v271_v12 = vld [vmem:[%s382_s3 + $0x38] sm:$0xff]  }
   0x4   :  { %240 = vmatpush3.bf16.msra.mxu1 %v264_v5  ;;  %v268_v9 = vld [vmem:[%s382_s3 + $0x20] sm:$0xff]  }
   0x5   :  { %241 = vmatprep.subr.bf16.mxu1 %v296_v1  ;;  %v211_v13 = vld [vmem:[%s381_s2] ss:$0 sm:$0xff] }
   0x6   :  { %236 = vmatmul.mubr.msk.bf16.vlgmr.msra.gmra.mrb[0].mxu0 %vm32_vm2, %v23_v4  ;;  %v213_v21 = vld [vmem:[%s383_s4] ss:$0 sm:$0xff] }
   0x8   :  { %242 = vmatpush3.bf16.msra.mxu1 %v265_v6 }
   0x9   :  { %243 = vmatprep.subr.bf16.mxu1 %v296_v1 }
   0xc   :  { %244 = vmatpush3.bf16.msra.mxu1 %v266_v7 }
   0xd   :  { %245 = vmatprep.subr.bf16.mxu1 %v296_v1 }
  0x10   :  { %246 = vmatpush3.bf16.msra.mxu1 %v267_v8 }
  0x11   :  { %247 = vmatprep.subr.bf16.mxu1 %v296_v1 }
  0x14   :  { %248 = vmatpush3.bf16.msra.mxu1 %v268_v9 }
  0x15   :  { %249 = vmatprep.subr.bf16.mxu1 %v296_v1 }
  0x18   :  { %250 = vmatpush3.bf16.msra.mxu1 %v269_v10 }
  0x19   :  { %251 = vmatprep.subr.bf16.mxu1 %v296_v1 }
  0x1c   :  { %252 = vmatpush3.bf16.msra.mxu1 %v270_v11 }
  0x1d   :  { %253 = vmatprep.subr.bf16.mxu1 %v296_v1 }
  0x20   :  { %254 = vmatpush3.bf16.msra.mxu1 %v271_v12 }
  0xd9   :  { %v74_v14 = vpop.f32.mrb[0].mxu0 }
  0xda   :  { %v75_v15 = vadd.f32 %v211_v13, %v74_v14  ;;  %v237_v16 = vpop.f32.mrb[1].mxu0 }
  0xdb   :  { %v77_v17 = vpop.f32.mrb[2].mxu0 }
  0xdc   :  { %v80_v18 = vmax.f32 %v75_v15, 0.0  ;;  %v238_v19 = vpop.f32.mrb[3].mxu0 }
  0xde   :  { %v81_v20 = vpack.c.bf16 %v80_v18, %v80_v18 }
  0xe0   :  { %256 = vmatmul.mubr.bf16.vlgmr.msra.gmra.mrb[0].mxu1 %v81_v20 }
 0x1b3   :  { %v187_v22 = vpop.f32.mrb[0].mxu1 }
 0x1b4   :  { %v188_v23 = vadd.f32 %v213_v21, %v187_v22  ;;  %v257_v24 = vpop.f32.mrb[1].mxu1 }
 0x1b5   :  { %v190_v25 = vpop.f32.mrb[2].mxu1 }
 0x1b6   :  { %194 = vst.msk [vmem:[#allocation2] sm:$0xff] %vm193_vm3, %v188_v23  ;;  %v258_v26 = vpop.f32.mrb[3].mxu1 }
 0x1b7   :  { %199 = vsyncadd [#allocation3], 96  ;;  %s298_s2 = smov [#allocation2]  }
 0x1b8   :  { %s200_s3 = sshll.u32 %s298_s2, 4  ;;  %s201_s3 = int_to_ptr.vmem [resolvable:$true] %s200_s3 }
 0x1b9   :  { %s272_s15 = scalar_lea.vmem %s201_s3, 32  ;;  %s276_s16 = scalar_lea.vmem %s201_s3, 128 }
 0x1ba   :  { %p273_p0 = scmp.ne.s32.totalorder %s201_s3, %s272_s15  ;;  %p277_p1 = scmp.lt.s32.totalorder %s201_s3, %s201_s3 }
 0x1bb   :  { %p278_p2 = scmp.lt.s32.totalorder %s276_s16, %s272_s15 }
 0x1bd   :  { %p279_p3 = por %p278_p2, %p277_p1 }
 0x1bf   :  { %p280_p4 = pnand %p279_p3, %p273_p0 }
 0x1c1   :  { %283 = shalt.err (!%p280_p4)
}
 0x1c2   :  { %s284_s18 = scalar_lea.hbm %s384_s5, 32 }
 0x1c3   :  { %p285_p5 = scmp.ne.s32.totalorder %s384_s5, %s284_s18  ;;  %p288_p6 = scmp.lt.u32.totalorder %s284_s18, %s384_s5 }
 0x1c5   :  { %p290_p7 = pnand %p288_p6, %p285_p5 }
 0x1c7   :  { %293 = shalt.err (!%p290_p7)
}
 0x1c8   :  { %s299_s23 = smov 32   ;;  %s300_s1 = smov 2  }
 0x1c9   :  { %206 = dma.vmem_to_hbm [thread:$0]  %s201_s3, 32, %s384_s5, [#allocation3], %s299_s23, %s299_s23, %s300_s1  }
 0x1ca   :  { %294 = dma.done.wait [#allocation3], 128  }
 0x1cb   :  { %295 = vsyncadd [#allocation3], 4294967168 }
 0x1cc   :  { %210 = vsyncpa [#allocation3], 1 }

</bundles_post_ra>
